<compile_context>
chip_gen: v6e
topology: v6e:2x2x1
jax: 0.10.0
libtpu: 0.0.40
codegen_flags: <defaults>
</compile_context>

<pallas_src>
import functools

import jax
import jax.numpy as jnp
from jax.experimental import pallas as pl
from jax.experimental.pallas import tpu as pltpu

IN_FEATURES = 10
OUT_FEATURES = 5
SUBLANE = 8  # f32 sublane tiling on the second-to-last dim


def _linear_relu_kernel(x_ref, w_ref, b_ref, o_ref):
    # y = relu(x @ w + b)
    # x_ref: (tm, IN), w_ref: (IN, OUT) (pre-transposed), b_ref: (1, OUT),
    # o_ref: (tm, OUT).  DMA-bound kernel; masked 5-lane stores are fine here.
    y = jnp.dot(x_ref[...], w_ref[...], preferred_element_type=jnp.float32)
    y = y + b_ref[...]
    o_ref[...] = jnp.maximum(y, 0.0).astype(o_ref.dtype)


def _round_up(n, m):
    return ((n + m - 1) // m) * m


@functools.partial(jax.jit, static_argnames=("block_m",))
def bug1_forward_pallas(x, weight, bias, *, block_m=8192):
    """relu(x @ weight.T + bias) via a Pallas TPU kernel.

    x: (B, 10) f32, weight: (5, 10) f32 (PyTorch nn.Linear layout),
    bias: (5,) f32 -> (B, 5) f32.
    """
    B, IN = x.shape
    OUT = weight.shape[0]

    # Batch tile: multiple of 8 (sublane rule), never larger than the array,
    # capped by block_m.  Last grid step may be ragged (handled by Pallas).
    if B < SUBLANE:
        tm = B  # full-extent block -> exempt from the sublane divisibility rule
    else:
        tm = min(block_m, (B // SUBLANE) * SUBLANE)

    w_t = weight.T                 # (IN, OUT): kernel does x @ w, no in-kernel .T
    bias_2d = bias.reshape(1, OUT)

    grid = (pl.cdiv(B, tm),)
    out = pl.pallas_call(
        _linear_relu_kernel,
        out_shape=jax.ShapeDtypeStruct((B, OUT), x.dtype),
        grid_spec=pl.GridSpec(
            grid=grid,
            in_specs=[
                # x streams in (tm, 10) blocks: last dim = full extent, so no
                # padded bytes move through HBM.
                pl.BlockSpec((tm, IN), lambda i: (i, 0)),
                # weight / bias are tiny and stay VMEM-resident.
                pl.BlockSpec((IN, OUT), lambda i: (0, 0)),
                pl.BlockSpec((1, OUT), lambda i: (0, 0)),
            ],
            out_specs=pl.BlockSpec((tm, OUT), lambda i: (i, 0)),
        ),
        compiler_params=pltpu.CompilerParams(
            # Independent batch tiles -> shard across TensorCores on v7x,
            # measured-neutral on v5e/v6e.
            dimension_semantics=("parallel",),
            # Lane-padded VMEM blocks are tm*512 B each for x and out; double
            # buffered, tm=8192 needs ~16 MiB.  48 MiB covers block_m up to
            # 16384, fixes v5e's 16 MiB default scoped limit, and stays under
            # v7x's 64 MiB physical VMEM.
            vmem_limit_bytes=48 * 1024 * 1024,
        ),
    )(x, w_t, bias_2d)
    return out


def bug1_forward(x, weight, bias, *, block_m=8192, min_pallas_batch=4096):
    """Dispatcher: tiny batches are launch-overhead bound -> plain fused XLA."""
    if x.shape[0] < min_pallas_batch:
        return jnp.maximum(x @ weight.T + bias, 0.0)
    return bug1_forward_pallas(x, weight, bias, block_m=block_m)


if __name__ == "__main__":
    key = jax.random.PRNGKey(0)
    k_x, k_w, k_b = jax.random.split(key, 3)

    B = 8
    # Deterministic parameter init (mimics nn.Linear uniform(-1/sqrt(in), 1/sqrt(in)))
    bound = 1.0 / jnp.sqrt(jnp.float32(IN_FEATURES))
    weight = jax.random.uniform(
        k_w, (OUT_FEATURES, IN_FEATURES), jnp.float32, -bound, bound)
    bias = jax.random.uniform(k_b, (OUT_FEATURES,), jnp.float32, -bound, bound)
    x = jax.random.normal(k_x, (B, IN_FEATURES), jnp.float32)

    # Exercise the Pallas kernel directly (the dispatcher would route B=8 to XLA).
    out = jax.block_until_ready(bug1_forward_pallas(x, weight, bias))

    # Reference check in plain JAX.
    ref = jnp.maximum(x @ weight.T + bias, 0.0)
    assert out.shape == (B, OUT_FEATURES)
    assert jnp.allclose(out, ref, atol=1e-5, rtol=1e-5)

    # Dispatcher fast path (small B) must agree too.
    out_dispatch = jax.block_until_ready(bug1_forward(x, weight, bias))
    assert jnp.allclose(out_dispatch, ref, atol=1e-5, rtol=1e-5)

    print("KERNEL_OK")
</pallas_src>

<mosaic_0001>
module attributes {stable_mosaic.version = 11 : i64} {
  func.func @_linear_relu_kernel(%arg0: i32, %arg1: memref<8x10xf32, #tpu.memory_space<vmem>>, %arg2: memref<10x5xf32, #tpu.memory_space<vmem>>, %arg3: memref<1x5xf32, #tpu.memory_space<vmem>>, %arg4: memref<8x5xf32, #tpu.memory_space<vmem>>) attributes {dimension_semantics = [#tpu.dimension_semantics<parallel>], iteration_bounds = array<i64: 1>, scalar_prefetch = 0 : i64, scratch_operands = 0 : i64, tpu.core_type = #tpu.core_type<tc>, window_params = [{transform_indices = @transform_0, window_bounds = array<i64: 8, 10>}, {pipeline_mode = #tpu.pipeline_mode<synchronous>, transform_indices = @transform_1, window_bounds = array<i64: 10, 5>}, {pipeline_mode = #tpu.pipeline_mode<synchronous>, transform_indices = @transform_2, window_bounds = array<i64: 1, 5>}, {transform_indices = @transform_3, window_bounds = array<i64: 8, 5>}]} {
    %c0 = arith.constant 0 : index
    %c0_0 = arith.constant 0 : index
    %0 = vector.load %arg1[%c0, %c0_0] : memref<8x10xf32, #tpu.memory_space<vmem>>, vector<8x10xf32>
    %c0_1 = arith.constant 0 : index
    %c0_2 = arith.constant 0 : index
    %1 = vector.load %arg2[%c0_1, %c0_2] : memref<10x5xf32, #tpu.memory_space<vmem>>, vector<10x5xf32>
    %cst = arith.constant dense<0.000000e+00> : vector<8x5xf32>
    %2 = tpu.matmul %0, %1, %cst {dimension_numbers = #tpu.dot_dimension_numbers<[1], [0], [0], [1], [0, 0, 1, 1], [], []>} : vector<8x10xf32>, vector<10x5xf32>, vector<8x5xf32> -> vector<8x5xf32>
    %c0_3 = arith.constant 0 : index
    %c0_4 = arith.constant 0 : index
    %3 = vector.load %arg3[%c0_3, %c0_4] : memref<1x5xf32, #tpu.memory_space<vmem>>, vector<1x5xf32>
    %4 = vector.broadcast %3 : vector<1x5xf32> to vector<8x5xf32>
    %5 = arith.addf %2, %4 : vector<8x5xf32>
    %cst_5 = arith.constant 0.000000e+00 : f32
    %6 = vector.broadcast %cst_5 : f32 to vector<8x5xf32>
    %7 = arith.maximumf %5, %6 : vector<8x5xf32>
    %c0_6 = arith.constant 0 : index
    %c0_7 = arith.constant 0 : index
    %8 = vector.load %arg4[%c0_6, %c0_7] : memref<8x5xf32, #tpu.memory_space<vmem>>, vector<8x5xf32>
    tpu.vector_store %arg4[%c0_6, %c0_7], %7 {strides = array<i32>} : memref<8x5xf32, #tpu.memory_space<vmem>>, vector<8x5xf32>,
    return
  }
  func.func @transform_0(%arg0: i32) -> (i32, i32) {
    %c0_i32 = arith.constant 0 : i32
    %c0_i32_0 = arith.constant 0 : i32
    return %arg0, %c0_i32 : i32, i32
  }
  func.func @transform_1(%arg0: i32) -> (i32, i32) {
    %c0_i32 = arith.constant 0 : i32
    %c0_i32_0 = arith.constant 0 : i32
    %c0_i32_1 = arith.constant 0 : i32
    return %c0_i32, %c0_i32_0 : i32, i32
  }
  func.func @transform_2(%arg0: i32) -> (i32, i32) {
    %c0_i32 = arith.constant 0 : i32
    %c0_i32_0 = arith.constant 0 : i32
    %c0_i32_1 = arith.constant 0 : i32
    return %c0_i32, %c0_i32_0 : i32, i32
  }
  func.func @transform_3(%arg0: i32) -> (i32, i32) {
    %c0_i32 = arith.constant 0 : i32
    %c0_i32_0 = arith.constant 0 : i32
    return %arg0, %c0_i32 : i32, i32
  }
}

</mosaic_0001>

<bundles_post_ra>
// kernel: bug1_forward_pallas.1
= control target key start
LH: loop header
LB: loop body
LE: loop exit
PB: predicated region body
PF: predicated region fallthrough
CT: control target
= control target key end

     0   :  { %vm29_vm0 = vcmask 1041408   ;;  %v158_v1 = vmov 0.0   ;;  %vm159_vm1 = vmmov 0   ;;  %s196_s0 = inlined_call_operand.vmem [shape: f32[8,10], index: 0, kind: input, shape index: {}]   ;;  %s197_s1 = inlined_call_operand.vmem [shape: f32[10,5], index: 1, kind: input, shape index: {}]   ;;  %s198_s2 = inlined_call_operand.vmem [shape: f32[1,5], index: 2, kind: input, shape index: {}]   ;;  %s199_s3 = inlined_call_operand.hbm [shape: f32[8,5], index: 3, kind: output, shape index: {}]  }
   0x1   :  { %v17_v0 = vld [vmem:[%s197_s1 + $0x8] sm:$0x3]  ;;  %126 = vmatprep.subr.mxu0 %v158_v1  ;;  %v16_v2 = vld [vmem:[%s197_s1] sm:$0xff]  ;;  %130 = vmatprep.mubr.msk.f32.mxu0 %vm159_vm1, %v158_v1 }
   0x2   :  { %8 = vsyncpa [#allocation3], 0  ;;  %127 = vmatpush3.msk.msra.mxu0 %vm29_vm0, %v17_v0  ;;  %v15_v3 = vld [vmem:[%s196_s0] sm:$0xff]  ;;  %vm25_vm2 = vcmask 80896   ;;  %s160_s20 = smov [#allocation2]   ;;  %vm104_vm3 = vcmask 39936  }
   0x3   :  { %128 = vmatprep.subr.mxu0 %v158_v1  ;;  %v120_v4 = vld [vmem:[%s198_s2] ss:$0 sm:$0xff]  ;;  %s112_s21 = sshll.u32 %s160_s20, 4  ;;  %s113_s21 = int_to_ptr.vmem [resolvable:$true] %s112_s21 }
   0x4   :  { %129 = vmatpush3.msra.mxu0 %v16_v2  ;;  %s136_s1 = scalar_lea.vmem %s113_s21, 128  ;;  %p141_p1 = scmp.lt.s32.totalorder %s113_s21, %s113_s21 }
   0x5   :  { %131 = vmatmul.mubr.msk.f32.vlgmr.msra.gmra.mxu0 %vm25_vm2, %v15_v3  ;;  %p137_p0 = scmp.ne.s32.totalorder %s113_s21, %s136_s1  ;;  %p142_p2 = scmp.lt.s32.totalorder %s136_s1, %s136_s1 }
   0x7   :  { %p143_p3 = por %p142_p2, %p141_p1 }
   0x9   :  { %p144_p4 = pnand %p143_p3, %p137_p0 }
  0xc5   :  { %v99_v5 = vpop.f32.mrf.mxu0 }
  0xc6   :  { %v100_v6 = vadd.f32 %v120_v4, %v99_v5 }
  0xc7   :  { %v132_v7 = vpop.f32.mrf.mxu0 }
  0xc8   :  { %v103_v8 = vmax.f32 %v100_v6, 0.0 }
  0xca   :  { %105 = vst.msk [vmem:[#allocation2] sm:$0xff] %vm104_vm3, %v103_v8 }
  0xcb   :  { %147 = shalt.err (!%p144_p4)
}
  0xcc   :  { %115 = dma.vmem_to_hbm [thread:$0]  %s113_s21, 128, %s199_s3, [#allocation3]  }
  0xcd   :  { %156 = dma.done.wait [#allocation3], 128  }
  0xce   :  { %157 = vsyncadd [#allocation3], 4294967168 }
  0xcf   :  { %119 = vsyncpa [#allocation3], 1 }

</bundles_post_ra>
